<compile_context>
chip_gen: v7x
topology: tpu7x:2x2x1
jax: 0.10.0
libtpu: 0.0.40
codegen_flags: <defaults>
</compile_context>

<pallas_src>
import jax
import jax.numpy as jnp
from jax.experimental import pallas as pl
from jax.experimental.pallas import tpu as pltpu


def option_policy_kernel(x_ref, w1_ref, b1_ref, w2_ref, b2_ref, out_ref):
    # x_ref:  (TILE_B, input_dim)   f32  (new block per grid step, pipelined)
    # w1_ref: (input_dim, hidden)   f32  (constant index_map -> VMEM-resident)
    # b1_ref: (1, hidden)           f32
    # w2_ref: (hidden, output_dim)  f32
    # b2_ref: (1, output_dim)       f32
    # out_ref:(TILE_B, output_dim)  f32
    x = x_ref[...]

    # fc1 + ReLU (MXU matmul, f32 accumulation).
    h = jnp.dot(x, w1_ref[...], preferred_element_type=jnp.float32) + b1_ref[...]
    h = jnp.maximum(h, 0.0)

    # fc2
    logits = jnp.dot(h, w2_ref[...], preferred_element_type=jnp.float32) + b2_ref[...]

    # Numerically-stable softmax over the last dim; exact division so rows sum to 1.
    m = jnp.max(logits, axis=-1, keepdims=True)
    e = jnp.exp(logits - m)
    denom = jnp.sum(e, axis=-1, keepdims=True)
    out_ref[...] = (e / denom).astype(out_ref.dtype)


def _xla_forward(state, w1, b1, w2, b2):
    # Fused XLA path: used as tiny-batch fallback and as the test reference.
    h = jnp.maximum(state @ w1 + b1, 0.0)
    return jax.nn.softmax(h @ w2 + b2, axis=-1)


def _round_up_16(n):
    return ((int(n) + 15) // 16) * 16


def option_policy_forward(state, w1, b1, w2, b2, *, tile_b=4096, min_pallas_batch=256):
    B, input_dim = state.shape
    hidden = w1.shape[1]
    output_dim = w2.shape[1]

    # Tiny batches (typical per-step policy call): one fused XLA op beats a pallas_call.
    if B < min_pallas_batch:
        return _xla_forward(state, w1, b1, w2, b2)

    # Batch tile: multiple of 16, sized so the grid has >= 2 steps, capped at 4096 rows
    # (keeps double-buffered tiles + f32 intermediates well inside default scoped VMEM
    # on v5e/v6e/v7x).  Sanitizes any user-provided tile_b.
    tile_cap = max(16, (min(int(tile_b), 4096) // 16) * 16)
    tile = min(_round_up_16(pl.cdiv(B, 2)), tile_cap)
    grid = (pl.cdiv(B, tile),)

    out = pl.pallas_call(
        option_policy_kernel,
        out_shape=jax.ShapeDtypeStruct((B, output_dim), jnp.float32),
        grid_spec=pl.GridSpec(
            grid=grid,
            in_specs=[
                # Batch-tiled input: new block per grid step (double-buffered).
                pl.BlockSpec((tile, input_dim), lambda i: (i, 0)),
                # Weights / biases: constant block index -> DMA'd once, VMEM-resident.
                pl.BlockSpec((input_dim, hidden), lambda i: (0, 0)),
                pl.BlockSpec((1, hidden), lambda i: (0, 0)),
                pl.BlockSpec((hidden, output_dim), lambda i: (0, 0)),
                pl.BlockSpec((1, output_dim), lambda i: (0, 0)),
            ],
            # Ragged last block (B not a multiple of tile) is masked on store.
            out_specs=pl.BlockSpec((tile, output_dim), lambda i: (i, 0)),
        ),
        compiler_params=pltpu.CompilerParams(
            dimension_semantics=("parallel",),  # batch tiles are independent
        ),
    )(state, w1, b1, w2, b2)
    return out


def init_params(key, input_dim, output_dim, hidden_dim=64):
    # Deterministic init mimicking nn.Linear's uniform(-1/sqrt(fan_in), 1/sqrt(fan_in)).
    k1, k2, k3, k4 = jax.random.split(key, 4)
    bound1 = 1.0 / jnp.sqrt(input_dim)
    bound2 = 1.0 / jnp.sqrt(hidden_dim)
    # Stored already transposed: (in, out).
    w1 = jax.random.uniform(k1, (input_dim, hidden_dim), jnp.float32, -bound1, bound1)
    b1 = jax.random.uniform(k2, (1, hidden_dim), jnp.float32, -bound1, bound1)
    w2 = jax.random.uniform(k3, (hidden_dim, output_dim), jnp.float32, -bound2, bound2)
    b2 = jax.random.uniform(k4, (1, output_dim), jnp.float32, -bound2, bound2)
    return w1, b1, w2, b2


if __name__ == "__main__":
    key = jax.random.PRNGKey(0)
    k_x1, k_x2, k_p = jax.random.split(key, 3)

    input_dim, output_dim, hidden_dim = 16, 8, 64
    w1, b1, w2, b2 = init_params(k_p, input_dim, output_dim, hidden_dim)

    # Case 1: Pallas path.  B=300 gives grid=(2,) with a ragged (masked) last block.
    B1 = 300
    state1 = jax.random.normal(k_x1, (B1, input_dim), jnp.float32)
    probs1 = jax.block_until_ready(option_policy_forward(state1, w1, b1, w2, b2))

    ref1 = _xla_forward(state1, w1, b1, w2, b2)
    assert probs1.shape == (B1, output_dim)
    # Tolerance covers possible matmul precision-mode differences between the Pallas
    # MXU dot and the XLA reference; no bf16 casts of our own anymore.
    assert jnp.allclose(probs1, ref1, atol=2e-3, rtol=2e-3)
    # Exact division -> rows sum to 1 up to f32 rounding.
    assert jnp.allclose(jnp.sum(probs1, axis=-1), 1.0, atol=1e-5)

    # Case 2: tiny per-step batch -> fused XLA fallback path.
    B2 = 2
    state2 = jax.random.normal(k_x2, (B2, input_dim), jnp.float32)
    probs2 = jax.block_until_ready(option_policy_forward(state2, w1, b1, w2, b2))

    ref2 = _xla_forward(state2, w1, b1, w2, b2)
    assert probs2.shape == (B2, output_dim)
    assert jnp.allclose(probs2, ref2, atol=2e-3, rtol=2e-3)
    assert jnp.allclose(jnp.sum(probs2, axis=-1), 1.0, atol=1e-5)

    print("KERNEL_OK")
</pallas_src>

<mosaic_0001>
module attributes {stable_mosaic.version = 11 : i64} {
  func.func @option_policy_kernel(%arg0: i32, %arg1: memref<160x16xf32, #tpu.memory_space<vmem>>, %arg2: memref<16x64xf32, #tpu.memory_space<vmem>>, %arg3: memref<1x64xf32, #tpu.memory_space<vmem>>, %arg4: memref<64x8xf32, #tpu.memory_space<vmem>>, %arg5: memref<1x8xf32, #tpu.memory_space<vmem>>, %arg6: memref<160x8xf32, #tpu.memory_space<vmem>>) attributes {dimension_semantics = [#tpu.dimension_semantics<parallel>], iteration_bounds = array<i64: 2>, scalar_prefetch = 0 : i64, scratch_operands = 0 : i64, tpu.core_type = #tpu.core_type<tc>, window_params = [{transform_indices = @transform_0, window_bounds = array<i64: 160, 16>}, {pipeline_mode = #tpu.pipeline_mode<synchronous>, transform_indices = @transform_1, window_bounds = array<i64: 16, 64>}, {pipeline_mode = #tpu.pipeline_mode<synchronous>, transform_indices = @transform_2, window_bounds = array<i64: 1, 64>}, {pipeline_mode = #tpu.pipeline_mode<synchronous>, transform_indices = @transform_3, window_bounds = array<i64: 64, 8>}, {pipeline_mode = #tpu.pipeline_mode<synchronous>, transform_indices = @transform_4, window_bounds = array<i64: 1, 8>}, {transform_indices = @transform_5, window_bounds = array<i64: 160, 8>}]} {
    %c0 = arith.constant 0 : index
    %c0_0 = arith.constant 0 : index
    %0 = vector.load %arg1[%c0, %c0_0] : memref<160x16xf32, #tpu.memory_space<vmem>>, vector<160x16xf32>
    %c0_1 = arith.constant 0 : index
    %c0_2 = arith.constant 0 : index
    %1 = vector.load %arg2[%c0_1, %c0_2] : memref<16x64xf32, #tpu.memory_space<vmem>>, vector<16x64xf32>
    %cst = arith.constant dense<0.000000e+00> : vector<160x64xf32>
    %2 = tpu.matmul %0, %1, %cst {dimension_numbers = #tpu.dot_dimension_numbers<[1], [0], [0], [1], [0, 0, 1, 1], [], []>} : vector<160x16xf32>, vector<16x64xf32>, vector<160x64xf32> -> vector<160x64xf32>
    %c0_3 = arith.constant 0 : index
    %c0_4 = arith.constant 0 : index
    %3 = vector.load %arg3[%c0_3, %c0_4] : memref<1x64xf32, #tpu.memory_space<vmem>>, vector<1x64xf32>
    %4 = vector.broadcast %3 : vector<1x64xf32> to vector<160x64xf32>
    %5 = arith.addf %2, %4 : vector<160x64xf32>
    %cst_5 = arith.constant 0.000000e+00 : f32
    %6 = vector.broadcast %cst_5 : f32 to vector<160x64xf32>
    %7 = arith.maximumf %5, %6 : vector<160x64xf32>
    %c0_6 = arith.constant 0 : index
    %c0_7 = arith.constant 0 : index
    %8 = vector.load %arg4[%c0_6, %c0_7] : memref<64x8xf32, #tpu.memory_space<vmem>>, vector<64x8xf32>
    %cst_8 = arith.constant dense<0.000000e+00> : vector<160x8xf32>
    %9 = tpu.matmul %7, %8, %cst_8 {dimension_numbers = #tpu.dot_dimension_numbers<[1], [0], [0], [1], [0, 0, 1, 1], [], []>} : vector<160x64xf32>, vector<64x8xf32>, vector<160x8xf32> -> vector<160x8xf32>
    %c0_9 = arith.constant 0 : index
    %c0_10 = arith.constant 0 : index
    %10 = vector.load %arg5[%c0_9, %c0_10] : memref<1x8xf32, #tpu.memory_space<vmem>>, vector<1x8xf32>
    %11 = vector.broadcast %10 : vector<1x8xf32> to vector<160x8xf32>
    %12 = arith.addf %9, %11 : vector<160x8xf32>
    %cst_11 = arith.constant dense<0xFF800000> : vector<160xf32>
    %13 = vector.multi_reduction <maximumf>, %12, %cst_11 [1] : vector<160x8xf32> to vector<160xf32>
    %14 = vector.shape_cast %13 : vector<160xf32> to vector<160x1xf32>
    %15 = vector.broadcast %14 : vector<160x1xf32> to vector<160x8xf32>
    %16 = arith.subf %12, %15 : vector<160x8xf32>
    %17 = math.exp %16 : vector<160x8xf32>
    %cst_12 = arith.constant dense<0.000000e+00> : vector<160xf32>
    %18 = vector.multi_reduction <add>, %17, %cst_12 [1] : vector<160x8xf32> to vector<160xf32>
    %19 = vector.shape_cast %18 : vector<160xf32> to vector<160x1xf32>
    %20 = vector.broadcast %19 : vector<160x1xf32> to vector<160x8xf32>
    %21 = arith.divf %17, %20 : vector<160x8xf32>
    %c0_13 = arith.constant 0 : index
    %c0_14 = arith.constant 0 : index
    %22 = vector.load %arg6[%c0_13, %c0_14] : memref<160x8xf32, #tpu.memory_space<vmem>>, vector<160x8xf32>
    tpu.vector_store %arg6[%c0_13, %c0_14], %21 {strides = array<i32>} : memref<160x8xf32, #tpu.memory_space<vmem>>, vector<160x8xf32>,
    return
  }
  func.func @transform_0(%arg0: i32) -> (i32, i32) {
    %c0_i32 = arith.constant 0 : i32
    %c0_i32_0 = arith.constant 0 : i32
    return %arg0, %c0_i32 : i32, i32
  }
  func.func @transform_1(%arg0: i32) -> (i32, i32) {
    %c0_i32 = arith.constant 0 : i32
    %c0_i32_0 = arith.constant 0 : i32
    %c0_i32_1 = arith.constant 0 : i32
    return %c0_i32, %c0_i32_0 : i32, i32
  }
  func.func @transform_2(%arg0: i32) -> (i32, i32) {
    %c0_i32 = arith.constant 0 : i32
    %c0_i32_0 = arith.constant 0 : i32
    %c0_i32_1 = arith.constant 0 : i32
    return %c0_i32, %c0_i32_0 : i32, i32
  }
  func.func @transform_3(%arg0: i32) -> (i32, i32) {
    %c0_i32 = arith.constant 0 : i32
    %c0_i32_0 = arith.constant 0 : i32
    %c0_i32_1 = arith.constant 0 : i32
    return %c0_i32, %c0_i32_0 : i32, i32
  }
  func.func @transform_4(%arg0: i32) -> (i32, i32) {
    %c0_i32 = arith.constant 0 : i32
    %c0_i32_0 = arith.constant 0 : i32
    %c0_i32_1 = arith.constant 0 : i32
    return %c0_i32, %c0_i32_0 : i32, i32
  }
  func.func @transform_5(%arg0: i32) -> (i32, i32) {
    %c0_i32 = arith.constant 0 : i32
    %c0_i32_0 = arith.constant 0 : i32
    return %arg0, %c0_i32 : i32, i32
  }
}

</mosaic_0001>

<bundles_post_ra>
// kernel: tpu_custom_call.1
= control target key start
LH: loop header
LB: loop body
LE: loop exit
PB: predicated region body
PF: predicated region fallthrough
CT: control target
= control target key end

     0   :  { %s1806_s18 = smov 0   ;;  %s1808_s19 = smov 0   ;;  %s2331_s0 = inlined_call_operand.vmem [shape: f32[300,16], index: 0, kind: input, shape index: {}]   ;;  %s2332_s1 = inlined_call_operand.vmem [shape: f32[16,64], index: 1, kind: input, shape index: {}]   ;;  %s2333_s2 = inlined_call_operand.vmem [shape: f32[1,64], index: 2, kind: input, shape index: {}]   ;;  %s2334_s3 = inlined_call_operand.vmem [shape: f32[64,8], index: 3, kind: input, shape index: {}]   ;;  %s2335_s4 = inlined_call_operand.vmem [shape: f32[1,8], index: 4, kind: input, shape index: {}]   ;;  %s2336_s5 = inlined_call_operand.vmem [shape: f32[300,8], index: 5, kind: output, shape index: {}]  }
   0x1   :  { %s1810_s20 = smov 0  }
   0x2 LB: > { %s1819_s21 = sadd.s32 4294967295, %s1742_s20   ;;  %s1821_s22 = sadd.s32 1, %s1742_s20   ;;  %s1742_s20 = sphi %s1810_s20, %s2343_s20   ;;  %s1738_s19 = sphi %s1808_s19, %s2342_s19   ;;  %s1734_s18 = sphi %s1806_s18, %s2341_s18  }
   0x3   : > { %s129_s23 = ssub.s32 %s1742_s20, %s1821_s22  ;;  %s132_s24 = sadd.s32 1, %s1738_s19 }
   0x4   : > { %p130_p0 = scmp.eq.s32.totalorder %s129_s23, 0  ;;  %p142_p1 = scmp.ne.s32.totalorder %s1738_s19, %s1734_s18 }
   0x5   : > { %p143_p2 = scmp.eq.s32.totalorder %s1819_s21, 1  ;;  %p1299_p3 = scmp.ge.s32.totalorder %s1742_s20, 1 }
   0x6   : > { %s1829_s25 = scalar_select %p130_p0, %s1738_s19, %s132_s24  }
   0x7   : > { %p1831_p4 = por %p143_p2, %p142_p1  ;;  %p196_p5 = scmp.lt.s32.totalorder %s1742_s20, 3 }
   0x9   : > { %p197_p6 = pnand %p1299_p3, %p196_p5 }
   0xa   : > { %v266_v0 = vld [vmem:[%s2332_s1] sm:$0xff] (!%p197_p6)  ;;  %v267_v1 = vld [vmem:[%s2332_s1 + $0x8] sm:$0xff] (!%p197_p6)  ;;  %s1842_s6 = smul.u32 (!%p197_p6), 20, %s1819_s21  ;;  %v523_v5 = vld [vmem:[%s2334_s3 + $0x10] sm:$0xff] (!%p197_p6)  ;;  %vm275_vm0 = vcmask (!%p197_p6), 130048   ;;  %vm536_vm1 = vcmask (!%p197_p6), 523264  }
   0xb   : > { %200 = sbr.rel (%p197_p6) target bundleno = 875 (0x36b), region = 40  ;;  %v521_v2 = vld [vmem:[%s2334_s3] sm:$0xff] (!%p197_p6)  ;;  %v1486_v3 = vpack.c.bf16 (!%p197_p6), %v267_v1, %v266_v0  ;;  %v522_v4 = vld [vmem:[%s2334_s3 + $0x8] sm:$0xff] (!%p197_p6)  ;;  %v524_v6 = vld [vmem:[%s2334_s3 + $0x18] sm:$0xff] (!%p197_p6)  ;;  %vm762_vm2 = vcmask (!%p197_p6), 64512   ;;  %s224_s14 = sand.u32 (!%p197_p6), 1, %s1734_s18  }
   0xc   : > { %p232_p7 = scmp.lt.s32.totalorder (!%p197_p6), %s1842_s6, 37  ;;  %v1490_v7 = vpack.c.bf16 (!%p197_p6), %v522_v4, %v521_v2  ;;  %v1494_v8 = vpack.c.bf16 (!%p197_p6), %v524_v6, %v523_v5  ;;  %v525_v9 = vld [vmem:[%s2334_s3 + $0x20] sm:$0xff] (!%p197_p6)  ;;  %v526_v10 = vld [vmem:[%s2334_s3 + $0x28] sm:$0xff] (!%p197_p6)  ;;  %v527_v15 = vld [vmem:[%s2334_s3 + $0x30] sm:$0xff] (!%p197_p6) }
   0xd   : > { %1487 = vmatprep.subr.bf16.mxu0 (!%p197_p6), %v1486_v3  ;;  %v1498_v14 = vpack.c.bf16 (!%p197_p6), %v526_v10, %v525_v9  ;;  %v528_v16 = vld [vmem:[%s2334_s3 + $0x38] sm:$0xff] (!%p197_p6)  ;;  %v1918_v35 = vld [vmem:[%s2333_s2] ss:$0 sm:$0xff] (!%p197_p6) }
   0xe   : > { %1489 = vmatpush3.bf16.msra.mxu0 (!%p197_p6), %v1486_v3  ;;  %1506 = vmatprep.subr.bf16.mxu1 (!%p197_p6), %v1490_v7  ;;  %v1502_v19 = vpack.c.bf16 (!%p197_p6), %v528_v16, %v527_v15 }
   0xf   : > { %1491 = vmatprep.subr.bf16.mxu0 (!%p197_p6), %v1490_v7  ;;  %1510 = vmatpush3.bf16.msra.mxu1 (!%p197_p6), %v1490_v7 }
  0x10   : > { %1507 = vmatprep.subr.bf16.mxu1 (!%p197_p6), %v1494_v8 }
  0x12   : > { %s233_s15 = scalar_select %p232_p7, %s1842_s6, 37 }
  0x13   : > { %1511 = vmatpush3.bf16.msra.mxu1 %v1494_v8  ;;  %s1011_s18 = ssub.s32 (%p1831_p4), 38, %s1842_s6  ;;  %s1355_s17 = smul.u32 (%p1831_p4), 160, %s1819_s21 }
  0x14   : > { %s1300_s24 = sshll.u32 %s233_s15, 3  ;;  %1508 = vmatprep.subr.bf16.mxu1 %v1498_v14  ;;  %s1514_s15 = smul.u32 160, %s224_s14 }
  0x15   : > { %s1867_s29 = scalar_lea.vmem %s2331_s0, %s1300_s24  ;;  %p1012_p8 = scmp.lt.s32.totalorder (%p1831_p4), %s1011_s18, 20 }
  0x16   : > { %v246_v11 = vld [vmem:[%s1867_s29] sm:$0xff]  ;;  %v247_v12 = vld [vmem:[%s1867_s29 + $0x8] sm:$0xff]  ;;  %v248_v13 = vld [vmem:[%s1867_s29 + $0x10] sm:$0xff]  ;;  %s2167_s16 = scalar_lea.vmem [#allocation2], %s1514_s15   ;;  %s2235_s24 = scalar_lea.vmem (%p1831_p4), %s2336_s5, %s1355_s17  }
  0x17   : > { %1410 = vmatprep.mubr.msk.f32.mxu0 %vm275_vm0, %v246_v11  ;;  %v249_v17 = vld [vmem:[%s1867_s29 + $0x18] sm:$0xff]  ;;  %v250_v18 = vld [vmem:[%s1867_s29 + $0x20] sm:$0xff]  ;;  %1512 = vmatpush3.bf16.msra.mxu1 %v1498_v14  ;;  %v251_v20 = vld [vmem:[%s1867_s29 + $0x28] sm:$0xff] }
  0x18   : > { %1411 = vmatmul.mubr.msk.f32.vlgmr.msra.gmra.mrb[0].mxu0 %vm275_vm0, %v247_v12  ;;  %1509 = vmatprep.subr.bf16.mxu1 %v1502_v19  ;;  %v252_v21 = vld [vmem:[%s1867_s29 + $0x30] sm:$0xff]  ;;  %v253_v22 = vld [vmem:[%s1867_s29 + $0x38] sm:$0xff]  ;;  %v254_v23 = vld [vmem:[%s1867_s29 + $0x40] sm:$0xff] }
  0x19   : > { %1413 = vmatprep.mubr.msk.f32.mxu0 %vm275_vm0, %v248_v13  ;;  %1493 = vmatpush3.bf16.msra.mxu0 %v1490_v7  ;;  %v255_v24 = vld [vmem:[%s1867_s29 + $0x48] sm:$0xff]  ;;  %v256_v25 = vld [vmem:[%s1867_s29 + $0x50] sm:$0xff]  ;;  %v257_v26 = vld [vmem:[%s1867_s29 + $0x58] sm:$0xff] }
  0x1a   : > { %1495 = vmatprep.subr.bf16.mxu0 %v1494_v8  ;;  %v258_v27 = vld [vmem:[%s1867_s29 + $0x60] sm:$0xff]  ;;  %v259_v28 = vld [vmem:[%s1867_s29 + $0x68] sm:$0xff]  ;;  %v260_v29 = vld [vmem:[%s1867_s29 + $0x70] sm:$0xff] }
  0x1b   : > { %1513 = vmatpush3.bf16.msra.mxu1 %v1502_v19  ;;  %v261_v30 = vld [vmem:[%s1867_s29 + $0x78] sm:$0xff]  ;;  %v262_v31 = vld [vmem:[%s1867_s29 + $0x80] sm:$0xff]  ;;  %v263_v32 = vld [vmem:[%s1867_s29 + $0x88] sm:$0xff] }
  0x1c   : > { %1414 = vmatmul.mubr.msk.f32.gmra.mrb[2].mxu0 %vm275_vm0, %v249_v17  ;;  %v264_v33 = vld [vmem:[%s1867_s29 + $0x90] sm:$0xff]  ;;  %v265_v34 = vld [vmem:[%s1867_s29 + $0x98] sm:$0xff] }
  0x1d   : > { %1416 = vmatprep.mubr.msk.f32.mxu0 %vm275_vm0, %v250_v18  ;;  %1497 = vmatpush3.bf16.msra.mxu0 %v1494_v8 }
  0x1e   : > { %1499 = vmatprep.subr.bf16.mxu0 %v1498_v14 }
  0x20   : > { %1417 = vmatmul.mubr.msk.f32.gmra.mrb[4].mxu0 %vm275_vm0, %v251_v20 }
  0x21   : > { %1419 = vmatprep.mubr.msk.f32.mxu0 %vm275_vm0, %v252_v21  ;;  %1501 = vmatpush3.bf16.msra.mxu0 %v1498_v14 }
  0x22   : > { %1503 = vmatprep.subr.bf16.mxu0 %v1502_v19 }
  0x24   : > { %1420 = vmatmul.mubr.msk.f32.gmra.mrb[6].mxu0 %vm275_vm0, %v253_v22 }
  0x25   : > { %1422 = vmatprep.mubr.msk.f32.mxu0 %vm275_vm0, %v254_v23  ;;  %1505 = vmatpush3.bf16.msra.mxu0 %v1502_v19 }
  0x28   : > { %1423 = vmatmul.mubr.msk.f32.gmra.mrb[8].mxu0 %vm275_vm0, %v255_v24 }
  0x29   : > { %1425 = vmatprep.mubr.msk.f32.mxu0 %vm275_vm0, %v256_v25 }
  0x2c   : > { %1426 = vmatmul.mubr.msk.f32.gmra.mrb[10].mxu0 %vm275_vm0, %v257_v26 }
  0x2d   : > { %1428 = vmatprep.mubr.msk.f32.mxu0 %vm275_vm0, %v258_v27 }
  0x30   : > { %1429 = vmatmul.mubr.msk.f32.gmra.mrb[12].mxu0 %vm275_vm0, %v259_v28 }
  0x31   : > { %1431 = vmatprep.mubr.msk.f32.mxu0 %vm275_vm0, %v260_v29 }
  0x34   : > { %1432 = vmatmul.mubr.msk.f32.gmra.mrb[14].mxu0 %vm275_vm0, %v261_v30 }
  0x35   : > { %1434 = vmatprep.mubr.msk.f32.mxu0 %vm275_vm0, %v262_v31 }
  0x38   : > { %1435 = vmatmul.mubr.msk.f32.gmra.mrb[16].mxu0 %vm275_vm0, %v263_v32  ;;  %v1963_v32 = vld [vmem:[%s2335_s4] ss:$0 sm:$0xff] }
  0x39   : > { %1437 = vmatprep.mubr.msk.f32.mxu0 %vm275_vm0, %v264_v33 }
  0x3c   : > { %1438 = vmatmul.mubr.msk.f32.gmra.mrb[18].mxu0 %vm275_vm0, %v265_v34 }
  0xeb   : > { %v1412_v36 = vpop.f32.mrb[0].mxu0 }
  0xec   : > { %v408_v37 = vadd.f32 %v1412_v36, %v1918_v35  ;;  %v402_v38 = vpop.f32.mrb[1].mxu0 }
  0xed   : > { %v403_v39 = vadd.f32 %v1918_v35, %v402_v38 }
  0xee   : > { %v502_v42 = vmax.f32 %v408_v37, 0.0 }
  0xef   : > { %v501_v40 = vmax.f32 %v403_v39, 0.0  ;;  %v1415_v41 = vpop.f32.mrb[2].mxu0 }
  0xf0   : > { %v418_v43 = vadd.f32 %v1415_v41, %v1918_v35  ;;  %v412_v44 = vpop.f32.mrb[3].mxu0 }
  0xf1   : > { %v413_v45 = vadd.f32 %v1918_v35, %v412_v44  ;;  %1456 = vmatprep.mubr.msk.f32.mxu0 %vm536_vm1, %v501_v40 }
  0xf2   : > { %1457 = vmatmul.mubr.msk.f32.vlgmr.msra.gmra.mrb[20].mxu0 %vm536_vm1, %v502_v42  ;;  %v504_v48 = vmax.f32 %v418_v43, 0.0 }
  0xf3   : > { %v503_v46 = vmax.f32 %v413_v45, 0.0  ;;  %v1418_v47 = vpop.f32.mrb[4].mxu0 }
  0xf4   : > { %v428_v49 = vadd.f32 %v1418_v47, %v1918_v35  ;;  %v422_v50 = vpop.f32.mrb[5].mxu0 }
  0xf5   : > { %v423_v51 = vadd.f32 %v1918_v35, %v422_v50  ;;  %1459 = vmatprep.mubr.msk.f32.mxu1 %vm536_vm1, %v503_v46 }
  0xf6   : > { %v506_v52 = vmax.f32 %v428_v49, 0.0  ;;  %1460 = vmatmul.mubr.msk.f32.vlgmr.msra.gmra.mrb[0].mxu1 %vm536_vm1, %v504_v48 }
  0xf7   : > { %v505_v53 = vmax.f32 %v423_v51, 0.0  ;;  %v1421_v54 = vpop.f32.mrb[6].mxu0 }
  0xf8   : > { %v438_v55 = vadd.f32 %v1421_v54, %v1918_v35  ;;  %v432_v56 = vpop.f32.mrb[7].mxu0 }
  0xf9   : > { %v433_v57 = vadd.f32 %v1918_v35, %v432_v56  ;;  %1462 = vmatprep.mubr.msk.f32.mxu1 %vm536_vm1, %v505_v53 }
  0xfa   : > { %v508_v58 = vmax.f32 %v438_v55, 0.0  ;;  %1463 = vmatmul.mubr.msk.f32.gmra.mrb[2].mxu1 %vm536_vm1, %v506_v52 }
  0xfb   : > { %v507_v59 = vmax.f32 %v433_v57, 0.0  ;;  %v1424_v60 = vpop.f32.mrb[8].mxu0 }
  0xfc   : > { %v448_v61 = vadd.f32 %v1424_v60, %v1918_v35  ;;  %v442_v62 = vpop.f32.mrb[9].mxu0 }
  0xfd   : > { %v443_v63 = vadd.f32 %v1918_v35, %v442_v62  ;;  %1465 = vmatprep.mubr.msk.f32.mxu1 %vm536_vm1, %v507_v59 }
  0xfe   : > { %v510_v0 = vmax.f32 %v448_v61, 0.0  ;;  %1466 = vmatmul.mubr.msk.f32.gmra.mrb[4].mxu1 %vm536_vm1, %v508_v58 }
  0xff   : > { %v509_v1 = vmax.f32 %v443_v63, 0.0  ;;  %v1427_v2 = vpop.f32.mrb[10].mxu0 }
 0x100   : > { %v458_v3 = vadd.f32 %v1427_v2, %v1918_v35  ;;  %v452_v4 = vpop.f32.mrb[11].mxu0 }
 0x101   : > { %v453_v5 = vadd.f32 %v1918_v35, %v452_v4  ;;  %1468 = vmatprep.mubr.msk.f32.mxu1 %vm536_vm1, %v509_v1 }
 0x102   : > { %v512_v6 = vmax.f32 %v458_v3, 0.0  ;;  %1469 = vmatmul.mubr.msk.f32.gmra.mrb[6].mxu1 %vm536_vm1, %v510_v0 }
 0x103   : > { %v511_v7 = vmax.f32 %v453_v5, 0.0  ;;  %v1430_v8 = vpop.f32.mrb[12].mxu0 }
 0x104   : > { %v468_v9 = vadd.f32 %v1430_v8, %v1918_v35  ;;  %v462_v10 = vpop.f32.mrb[13].mxu0 }
 0x105   : > { %v463_v11 = vadd.f32 %v1918_v35, %v462_v10  ;;  %1471 = vmatprep.mubr.msk.f32.mxu1 %vm536_vm1, %v511_v7 }
 0x106   : > { %v514_v12 = vmax.f32 %v468_v9, 0.0  ;;  %1472 = vmatmul.mubr.msk.f32.gmra.mrb[8].mxu1 %vm536_vm1, %v512_v6 }
 0x107   : > { %v513_v13 = vmax.f32 %v463_v11, 0.0  ;;  %v1433_v14 = vpop.f32.mrb[14].mxu0 }
 0x108   : > { %v478_v15 = vadd.f32 %v1433_v14, %v1918_v35  ;;  %v472_v16 = vpop.f32.mrb[15].mxu0 }
 0x109   : > { %v473_v17 = vadd.f32 %v1918_v35, %v472_v16  ;;  %1474 = vmatprep.mubr.msk.f32.mxu1 %vm536_vm1, %v513_v13 }
 0x10a   : > { %v516_v18 = vmax.f32 %v478_v15, 0.0  ;;  %1475 = vmatmul.mubr.msk.f32.gmra.mrb[10].mxu1 %vm536_vm1, %v514_v12 }
 0x10b   : > { %v515_v19 = vmax.f32 %v473_v17, 0.0  ;;  %v1436_v20 = vpop.f32.mrb[16].mxu0 }
 0x10c   : > { %v488_v21 = vadd.f32 %v1436_v20, %v1918_v35  ;;  %v482_v22 = vpop.f32.mrb[17].mxu0 }
 0x10d   : > { %v483_v23 = vadd.f32 %v1918_v35, %v482_v22  ;;  %1477 = vmatprep.mubr.msk.f32.mxu1 %vm536_vm1, %v515_v19 }
 0x10e   : > { %v518_v24 = vmax.f32 %v488_v21, 0.0  ;;  %1478 = vmatmul.mubr.msk.f32.gmra.mrb[12].mxu1 %vm536_vm1, %v516_v18 }
 0x10f   : > { %v517_v25 = vmax.f32 %v483_v23, 0.0  ;;  %v1439_v26 = vpop.f32.mrb[18].mxu0 }
 0x110   : > { %v498_v27 = vadd.f32 %v1439_v26, %v1918_v35  ;;  %v492_v28 = vpop.f32.mrb[19].mxu0 }
 0x111   : > { %v493_v29 = vadd.f32 %v1918_v35, %v492_v28  ;;  %1480 = vmatprep.mubr.msk.f32.mxu1 %vm536_vm1, %v517_v25 }
 0x112   : > { %v520_v30 = vmax.f32 %v498_v27, 0.0  ;;  %1481 = vmatmul.mubr.msk.f32.gmra.mrb[14].mxu1 %vm536_vm1, %v518_v24 }
 0x113   : > { %v519_v31 = vmax.f32 %v493_v29, 0.0 }
 0x115   : > { %1483 = vmatprep.mubr.msk.f32.mxu1 %vm536_vm1, %v519_v31 }
 0x116   : > { %1484 = vmatmul.mubr.msk.f32.gmra.mrb[16].mxu1 %vm536_vm1, %v520_v30 }
 0x1c5   : > { %v1458_v33 = vpop.f32.mrb[20].mxu0 }
 0x1c6   : > { %v1966_v34 = vadd.f32 %v1458_v33, %v1963_v32  ;;  %v663_v35 = vpop.f32.mrb[21].mxu0 }
 0x1c7   : > { %v1969_v36 = vadd.f32 %v1963_v32, %v663_v35 }
 0x1c8   : > { %v766_v37 = vsel %vm762_vm2, %v1966_v34, -inf }
 0x1c9   : > { %v1461_v38 = vpop.f32.mrb[0].mxu1  ;;  %767 = vmax.xlane.f32.xlu0 %v766_v37  ;;  %v763_v43 = vsel %vm762_vm2, %v1969_v36, -inf }
 0x1ca   : > { %v1974_v39 = vadd.f32 %v1461_v38, %v1963_v32  ;;  %v673_v40 = vpop.f32.mrb[1].mxu1 }
 0x1cb   : > { %v1977_v41 = vadd.f32 %v1963_v32, %v673_v40 }
 0x1cc   : > { %v772_v42 = vsel %vm762_vm2, %v1974_v39, -inf }
 0x1cd   : > { %773 = vmax.xlane.f32.xlu1 %v772_v42  ;;  %v1464_v44 = vpop.f32.mrb[2].mxu1  ;;  %764 = vmax.xlane.f32.xlu0 %v763_v43  ;;  %v769_v48 = vsel %vm762_vm2, %v1977_v41, -inf }
 0x1ce   : > { %v683_v45 = vpop.f32.mrb[3].mxu1  ;;  %v1987_v47 = vadd.f32 %v1464_v44, %v1963_v32 }
 0x1cf   : > { %v1984_v46 = vadd.f32 %v1963_v32, %v683_v45 }
 0x1d0   : > { %v778_v54 = vsel %vm762_vm2, %v1987_v47, -inf }
 0x1d1   : > { %v1467_v49 = vpop.f32.mrb[4].mxu1  ;;  %770 = vmax.xlane.f32.xlu1 %v769_v48  ;;  %v775_v50 = vsel %vm762_vm2, %v1984_v46, -inf }
 0x1d2   : > { %v693_v51 = vpop.f32.mrb[5].mxu1  ;;  %776 = vmax.xlane.f32.xlu0 %v775_v50  ;;  %v1997_v53 = vadd.f32 %v1467_v49, %v1963_v32 }
 0x1d3   : > { %v1994_v52 = vadd.f32 %v1963_v32, %v693_v51 }
 0x1d4   : > { %v784_v60 = vsel %vm762_vm2, %v1997_v53, -inf }
 0x1d5   : > { %v1470_v55 = vpop.f32.mrb[6].mxu1  ;;  %779 = vmax.xlane.f32.xlu1 %v778_v54  ;;  %v781_v56 = vsel %vm762_vm2, %v1994_v52, -inf }
 0x1d6   : > { %v703_v57 = vpop.f32.mrb[7].mxu1  ;;  %782 = vmax.xlane.f32.xlu0 %v781_v56  ;;  %v2007_v59 = vadd.f32 %v1470_v55, %v1963_v32 }
 0x1d7   : > { %v2004_v58 = vadd.f32 %v1963_v32, %v703_v57 }
 0x1d8   : > { %v790_v2 = vsel %vm762_vm2, %v2007_v59, -inf }
 0x1d9   : > { %v1473_v61 = vpop.f32.mrb[8].mxu1  ;;  %785 = vmax.xlane.f32.xlu1 %v784_v60  ;;  %v787_v62 = vsel %vm762_vm2, %v2004_v58, -inf }
 0x1da   : > { %v713_v63 = vpop.f32.mrb[9].mxu1  ;;  %788 = vmax.xlane.f32.xlu0 %v787_v62  ;;  %v2017_v1 = vadd.f32 %v1473_v61, %v1963_v32 }
 0x1db   : > { %v2014_v0 = vadd.f32 %v1963_v32, %v713_v63 }
 0x1dc   : > { %v796_v8 = vsel %vm762_vm2, %v2017_v1, -inf }
 0x1dd   : > { %v1476_v3 = vpop.f32.mrb[10].mxu1  ;;  %791 = vmax.xlane.f32.xlu1 %v790_v2  ;;  %v793_v4 = vsel %vm762_vm2, %v2014_v0, -inf }
 0x1de   : > { %v723_v5 = vpop.f32.mrb[11].mxu1  ;;  %794 = vmax.xlane.f32.xlu0 %v793_v4  ;;  %v2027_v7 = vadd.f32 %v1476_v3, %v1963_v32 }
 0x1df   : > { %v2024_v6 = vadd.f32 %v1963_v32, %v723_v5 }
 0x1e0   : > { %v802_v14 = vsel %vm762_vm2, %v2027_v7, -inf }
 0x1e1   : > { %v1479_v9 = vpop.f32.mrb[12].mxu1  ;;  %797 = vmax.xlane.f32.xlu1 %v796_v8  ;;  %v799_v10 = vsel %vm762_vm2, %v2024_v6, -inf }
 0x1e2   : > { %v733_v11 = vpop.f32.mrb[13].mxu1  ;;  %800 = vmax.xlane.f32.xlu0 %v799_v10  ;;  %v2037_v13 = vadd.f32 %v1479_v9, %v1963_v32 }
 0x1e3   : > { %v2034_v12 = vadd.f32 %v1963_v32, %v733_v11 }
 0x1e4   : > { %v808_v20 = vsel %vm762_vm2, %v2037_v13, -inf }
 0x1e5   : > { %v1482_v15 = vpop.f32.mrb[14].mxu1  ;;  %803 = vmax.xlane.f32.xlu1 %v802_v14  ;;  %v805_v16 = vsel %vm762_vm2, %v2034_v12, -inf }
 0x1e6   : > { %v743_v17 = vpop.f32.mrb[15].mxu1  ;;  %806 = vmax.xlane.f32.xlu0 %v805_v16  ;;  %v2047_v19 = vadd.f32 %v1482_v15, %v1963_v32 }
 0x1e7   : > { %v2044_v18 = vadd.f32 %v1963_v32, %v743_v17 }
 0x1e8   : > { %v814_v26 = vsel %vm762_vm2, %v2047_v19, -inf }
 0x1e9   : > { %v1485_v21 = vpop.f32.mrb[16].mxu1  ;;  %809 = vmax.xlane.f32.xlu1 %v808_v20  ;;  %v811_v22 = vsel %vm762_vm2, %v2044_v18, -inf }
 0x1ea   : > { %v753_v23 = vpop.f32.mrb[17].mxu1  ;;  %812 = vmax.xlane.f32.xlu0 %v811_v22  ;;  %v2057_v25 = vadd.f32 %v1485_v21, %v1963_v32 }
 0x1eb   : > { %v2054_v24 = vadd.f32 %v1963_v32, %v753_v23 }
 0x1ec   : > { %v820_v28 = vsel %vm762_vm2, %v2057_v25, -inf }
 0x1ed   : > { %815 = vmax.xlane.f32.xlu1 %v814_v26  ;;  %v817_v27 = vsel %vm762_vm2, %v2054_v24, -inf }
 0x1ee   : > { %818 = vmax.xlane.f32.xlu0 %v817_v27 }
 0x1f1   : > { %821 = vmax.xlane.f32.xlu1 %v820_v28 }
 0x256   : > { %v768_v29 = vpop.xlane.xlu0 %767 }
 0x257   : > { %v824_v30 = vsub.f32 %v1966_v34, %v768_v29 }
 0x259   : > { %v845_v31 = vmul.f32 1.442695, %v824_v30 }
 0x25a   : > { %v774_v33 = vpop.xlane.xlu1 %773  ;;  %v765_v35 = vpop.xlane.xlu0 %764 }
 0x25b   : > { %1604 = vpow2.f32 %v845_v31  ;;  %v826_v32 = vsub.f32 %v1974_v39, %v774_v33  ;;  %v823_v37 = vsub.f32 %v1969_v36, %v765_v35 }
 0x25d   : > { %v849_v38 = vmul.f32 1.442695, %v826_v32  ;;  %v843_v40 = vmul.f32 1.442695, %v823_v37 }
 0x25e   : > { %v771_v42 = vpop.xlane.xlu1 %770 }
 0x25f   : > { %1606 = vpow2.f32 %v849_v38  ;;  %v825_v43 = vsub.f32 %v1977_v41, %v771_v42  ;;  %v777_v44 = vpop.xlane.xlu0 %776 }
 0x260   : > { %1608 = vpow2.f32 %v843_v40  ;;  %v827_v45 = vsub.f32 %v1984_v46, %v777_v44 }
 0x261   : > { %v847_v48 = vmul.f32 1.442695, %v825_v43 }
 0x262   : > { %v851_v34 = vmul.f32 1.442695, %v827_v45  ;;  %v780_v49 = vpop.xlane.xlu1 %779 }
 0x263   : > { %1610 = vpow2.f32 %v847_v48  ;;  %v828_v50 = vsub.f32 %v1987_v47, %v780_v49  ;;  %v783_v51 = vpop.xlane.xlu0 %782 }
 0x264   : > { %v829_v39 = vsub.f32 %v1994_v52, %v783_v51  ;;  %1612 = vpow2.f32 %v851_v34 }
 0x265   : > { %v2072_v36 = vpop.eup %1604  ;;  %v853_v54 = vmul.f32 1.442695, %v828_v50 }
 0x266   : > { %v855_v55 = vmul.f32 1.442695, %v829_v39  ;;  %v786_v56 = vpop.xlane.xlu1 %785  ;;  %v886_v41 = vsel %vm762_vm2, %v2072_v36, 0.0 }
 0x267   : > { %1614 = vpow2.f32 %v853_v54  ;;  %v830_v46 = vsub.f32 %v1997_v53, %v786_v56  ;;  %887 = vadd.xlane.f32.xlu1 %v886_v41  ;;  %v789_v57 = vpop.xlane.xlu0 %788 }
 0x268   : > { %v831_v60 = vsub.f32 %v2004_v58, %v789_v57  ;;  %1616 = vpow2.f32 %v855_v55 }
 0x269   : > { %v2078_v47 = vpop.eup %1606  ;;  %v857_v61 = vmul.f32 1.442695, %v830_v46 }
 0x26a   : > { %v2080_v52 = vpop.eup %1608  ;;  %v859_v62 = vmul.f32 1.442695, %v831_v60  ;;  %v792_v63 = vpop.xlane.xlu1 %791  ;;  %v892_v2 = vsel %vm762_vm2, %v2078_v47, 0.0 }
 0x26b   : > { %1618 = vpow2.f32 %v857_v61  ;;  %v832_v3 = vsub.f32 %v2007_v59, %v792_v63  ;;  %893 = vadd.xlane.f32.xlu1 %v892_v2  ;;  %v883_v53 = vsel %vm762_vm2, %v2080_v52, 0.0  ;;  %v795_v4 = vpop.xlane.xlu0 %794 }
 0x26c   : > { %884 = vadd.xlane.f32.xlu0 %v883_v53  ;;  %v833_v58 = vsub.f32 %v2014_v0, %v795_v4  ;;  %1620 = vpow2.f32 %v859_v62 }
 0x26d   : > { %v2088_v5 = vpop.eup %1610  ;;  %v861_v8 = vmul.f32 1.442695, %v832_v3 }
 0x26e   : > { %v863_v9 = vmul.f32 1.442695, %v833_v58  ;;  %v798_v10 = vpop.xlane.xlu1 %797  ;;  %v889_v11 = vsel %vm762_vm2, %v2088_v5, 0.0  ;;  %v2093_v15 = vpop.eup %1612 }
 0x26f   : > { %1622 = vpow2.f32 %v861_v8  ;;  %v834_v59 = vsub.f32 %v2017_v1, %v798_v10  ;;  %v801_v14 = vpop.xlane.xlu0 %800  ;;  %v895_v1 = vsel %vm762_vm2, %v2093_v15, 0.0 }
 0x270   : > { %890 = vadd.xlane.f32.xlu0 %v889_v11  ;;  %v835_v16 = vsub.f32 %v2024_v6, %v801_v14  ;;  %1624 = vpow2.f32 %v863_v9 }
 0x271   : > { %v2096_v17 = vpop.eup %1614  ;;  %v865_v0 = vmul.f32 1.442695, %v834_v59 }
 0x272   : > { %v867_v20 = vmul.f32 1.442695, %v835_v16  ;;  %v804_v21 = vpop.xlane.xlu1 %803  ;;  %v898_v22 = vsel %vm762_vm2, %v2096_v17, 0.0  ;;  %v2103_v27 = vpop.eup %1616 }
 0x273   : > { %1626 = vpow2.f32 %v865_v0  ;;  %v836_v23 = vsub.f32 %v2027_v7, %v804_v21  ;;  %899 = vadd.xlane.f32.xlu1 %v898_v22  ;;  %v807_v26 = vpop.xlane.xlu0 %806  ;;  %v901_v35 = vsel %vm762_vm2, %v2103_v27, 0.0 }
 0x274   : > { %896 = vadd.xlane.f32.xlu0 %v895_v1  ;;  %v837_v6 = vsub.f32 %v2034_v12, %v807_v26  ;;  %1628 = vpow2.f32 %v867_v20 }
 0x275   : > { %v2106_v28 = vpop.eup %1618  ;;  %v869_v29 = vmul.f32 1.442695, %v836_v23 }
 0x276   : > { %v871_v30 = vmul.f32 1.442695, %v837_v6  ;;  %v810_v31 = vpop.xlane.xlu1 %809  ;;  %v904_v33 = vsel %vm762_vm2, %v2106_v28, 0.0  ;;  %v2113_v37 = vpop.eup %1620 }
 0x277   : > { %1630 = vpow2.f32 %v869_v29  ;;  %v838_v7 = vsub.f32 %v2037_v13, %v810_v31  ;;  %905 = vadd.xlane.f32.xlu1 %v904_v33  ;;  %v813_v32 = vpop.xlane.xlu0 %812  ;;  %v907_v45 = vsel %vm762_vm2, %v2113_v37, 0.0 }
 0x278   : > { %902 = vadd.xlane.f32.xlu0 %v901_v35  ;;  %v839_v12 = vsub.f32 %v2044_v18, %v813_v32  ;;  %1632 = vpow2.f32 %v871_v30 }
 0x279   : > { %v2116_v38 = vpop.eup %1622  ;;  %v873_v40 = vmul.f32 1.442695, %v838_v7 }
 0x27a   : > { %v875_v42 = vmul.f32 1.442695, %v839_v12  ;;  %v816_v43 = vpop.xlane.xlu1 %815  ;;  %v910_v44 = vsel %vm762_vm2, %v2116_v38, 0.0  ;;  %v2123_v34 = vpop.eup %1624 }
 0x27b   : > { %1634 = vpow2.f32 %v873_v40  ;;  %v840_v13 = vsub.f32 %v2047_v19, %v816_v43  ;;  %911 = vadd.xlane.f32.xlu1 %v910_v44  ;;  %v819_v48 = vpop.xlane.xlu0 %818  ;;  %v913_v55 = vsel %vm762_vm2, %v2123_v34, 0.0 }
 0x27c   : > { %908 = vadd.xlane.f32.xlu0 %v907_v45  ;;  %v841_v18 = vsub.f32 %v2054_v24, %v819_v48  ;;  %1636 = vpow2.f32 %v875_v42 }
 0x27d   : > { %v2126_v49 = vpop.eup %1626  ;;  %v877_v50 = vmul.f32 1.442695, %v840_v13 }
 0x27e   : > { %v879_v51 = vmul.f32 1.442695, %v841_v18  ;;  %v822_v39 = vpop.xlane.xlu1 %821  ;;  %v916_v54 = vsel %vm762_vm2, %v2126_v49, 0.0  ;;  %v2133_v56 = vpop.eup %1628 }
 0x27f   : > { %1638 = vpow2.f32 %v877_v50  ;;  %v842_v19 = vsub.f32 %v2057_v25, %v822_v39  ;;  %917 = vadd.xlane.f32.xlu1 %v916_v54  ;;  %v919_v57 = vsel %vm762_vm2, %v2133_v56, 0.0 }
 0x280   : > { %914 = vadd.xlane.f32.xlu0 %v913_v55  ;;  %1640 = vpow2.f32 %v879_v51 }
 0x281   : > { %v2135_v24 = vpop.eup %1630  ;;  %v881_v41 = vmul.f32 1.442695, %v842_v19 }
 0x282   : > { %v922_v46 = vsel %vm762_vm2, %v2135_v24, 0.0  ;;  %v2141_v25 = vpop.eup %1632 }
 0x283   : > { %1642 = vpow2.f32 %v881_v41  ;;  %923 = vadd.xlane.f32.xlu1 %v922_v46  ;;  %v925_v62 = vsel %vm762_vm2, %v2141_v25, 0.0 }
 0x284   : > { %920 = vadd.xlane.f32.xlu0 %v919_v57 }
 0x285   : > { %v2143_v60 = vpop.eup %1634 }
 0x286   : > { %v928_v61 = vsel %vm762_vm2, %v2143_v60, 0.0  ;;  %v2149_v63 = vpop.eup %1636 }
 0x287   : > { %929 = vadd.xlane.f32.xlu1 %v928_v61  ;;  %v931_v53 = vsel %vm762_vm2, %v2149_v63, 0.0 }
 0x288   : > { %926 = vadd.xlane.f32.xlu0 %v925_v62 }
 0x289   : > { %v2151_v2 = vpop.eup %1638 }
 0x28a   : > { %v934_v3 = vsel %vm762_vm2, %v2151_v2, 0.0  ;;  %v2157_v4 = vpop.eup %1640 }
 0x28b   : > { %935 = vadd.xlane.f32.xlu1 %v934_v3  ;;  %v937_v9 = vsel %vm762_vm2, %v2157_v4, 0.0 }
 0x28c   : > { %932 = vadd.xlane.f32.xlu0 %v931_v53 }
 0x28d   : > { %v2159_v58 = vpop.eup %1642 }
 0x28e   : > { %v940_v8 = vsel %vm762_vm2, %v2159_v58, 0.0 }
 0x28f   : > { %941 = vadd.xlane.f32.xlu1 %v940_v8 }
 0x290   : > { %938 = vadd.xlane.f32.xlu0 %v937_v9 }
 0x2f4   : > { %v888_v10 = vpop.xlane.xlu1 %887 }
 0x2f5   : > { %1644 = vrcp.f32 %v888_v10 }
 0x2f8   : > { %v894_v11 = vpop.xlane.xlu1 %893 }
 0x2f9   : > { %1646 = vrcp.f32 %v894_v11  ;;  %v885_v59 = vpop.xlane.xlu0 %884 }
 0x2fa   : > { %1648 = vrcp.f32 %v885_v59 }
 0x2fd   : > { %v891_v14 = vpop.xlane.xlu0 %890 }
 0x2fe   : > { %1650 = vrcp.f32 %v891_v14 }
 0x2ff   : > { %v1645_v16 = vpop.eup %1644 }
 0x300   : > { %v946_v0 = vmul.f32 %v1645_v16, %v2072_v36  ;;  %v900_v20 = vpop.xlane.xlu1 %899 }
 0x301   : > { %1652 = vrcp.f32 %v900_v20  ;;  %v897_v21 = vpop.xlane.xlu0 %896 }
 0x302   : > { %984 = vst.msk [vmem:[%s2167_s16 + $0x8] sm:$0xff] %vm762_vm2, %v946_v0  ;;  %1654 = vrcp.f32 %v897_v21 }
 0x303   : > { %v1647_v22 = vpop.eup %1646 }
 0x304   : > { %v1649_v23 = vpop.eup %1648  ;;  %v950_v1 = vmul.f32 %v1647_v22, %v2078_v47  ;;  %v906_v26 = vpop.xlane.xlu1 %905 }
 0x305   : > { %v944_v6 = vmul.f32 %v1649_v23, %v2080_v52  ;;  %1656 = vrcp.f32 %v906_v26  ;;  %v903_v36 = vpop.xlane.xlu0 %902 }
 0x306   : > { %986 = vst.msk [vmem:[%s2167_s16 + $0x18] sm:$0xff] %vm762_vm2, %v950_v1  ;;  %1658 = vrcp.f32 %v903_v36 }
 0x307   : > { %983 = vst.msk [vmem:[%s2167_s16] sm:$0xff] %vm762_vm2, %v944_v6 }
 0x308   : > { %v1651_v29 = vpop.eup %1650  ;;  %v912_v30 = vpop.xlane.xlu1 %911 }
 0x309   : > { %v948_v31 = vmul.f32 %v1651_v29, %v2088_v5  ;;  %1660 = vrcp.f32 %v912_v30  ;;  %v909_v33 = vpop.xlane.xlu0 %908 }
 0x30a   : > { %1662 = vrcp.f32 %v909_v33 }
 0x30b   : > { %v1653_v47 = vpop.eup %1652  ;;  %985 = vst.msk [vmem:[%s2167_s16 + $0x10] sm:$0xff] %vm762_vm2, %v948_v31 }
 0x30c   : > { %v1655_v52 = vpop.eup %1654  ;;  %v954_v7 = vmul.f32 %v1653_v47, %v2096_v17  ;;  %v918_v35 = vpop.xlane.xlu1 %917 }
 0x30d   : > { %v952_v32 = vmul.f32 %v1655_v52, %v2093_v15  ;;  %1664 = vrcp.f32 %v918_v35  ;;  %v915_v12 = vpop.xlane.xlu0 %914 }
 0x30e   : > { %988 = vst.msk [vmem:[%s2167_s16 + $0x28] sm:$0xff] %vm762_vm2, %v954_v7  ;;  %1666 = vrcp.f32 %v915_v12 }
 0x30f   : > { %v1657_v5 = vpop.eup %1656  ;;  %987 = vst.msk [vmem:[%s2167_s16 + $0x20] sm:$0xff] %vm762_vm2, %v952_v32 }
 0x310   : > { %v1659_v40 = vpop.eup %1658  ;;  %v958_v42 = vmul.f32 %v1657_v5, %v2106_v28  ;;  %v924_v43 = vpop.xlane.xlu1 %923 }
 0x311   : > { %v956_v44 = vmul.f32 %v1659_v40, %v2103_v27  ;;  %1668 = vrcp.f32 %v924_v43  ;;  %v921_v17 = vpop.xlane.xlu0 %920 }
 0x312   : > { %990 = vst.msk [vmem:[%s2167_s16 + $0x38] sm:$0xff] %vm762_vm2, %v958_v42  ;;  %1670 = vrcp.f32 %v921_v17 }
 0x313   : > { %v1661_v15 = vpop.eup %1660  ;;  %989 = vst.msk [vmem:[%s2167_s16 + $0x30] sm:$0xff] %vm762_vm2, %v956_v44 }
 0x314   : > { %v1663_v13 = vpop.eup %1662  ;;  %v962_v45 = vmul.f32 %v1661_v15, %v2116_v38  ;;  %v930_v48 = vpop.xlane.xlu1 %929 }
 0x315   : > { %v960_v18 = vmul.f32 %v1663_v13, %v2113_v37  ;;  %1672 = vrcp.f32 %v930_v48  ;;  %v927_v28 = vpop.xlane.xlu0 %926 }
 0x316   : > { %992 = vst.msk [vmem:[%s2167_s16 + $0x48] sm:$0xff] %vm762_vm2, %v962_v45  ;;  %1674 = vrcp.f32 %v927_v28 }
 0x317   : > { %v1665_v27 = vpop.eup %1664  ;;  %991 = vst.msk [vmem:[%s2167_s16 + $0x40] sm:$0xff] %vm762_vm2, %v960_v18 }
 0x318   : > { %v1667_v50 = vpop.eup %1666  ;;  %v966_v51 = vmul.f32 %v1665_v27, %v2126_v49  ;;  %v936_v39 = vpop.xlane.xlu1 %935 }
 0x319   : > { %v964_v54 = vmul.f32 %v1667_v50, %v2123_v34  ;;  %1676 = vrcp.f32 %v936_v39  ;;  %v933_v38 = vpop.xlane.xlu0 %932 }
 0x31a   : > { %994 = vst.msk [vmem:[%s2167_s16 + $0x58] sm:$0xff] %vm762_vm2, %v966_v51  ;;  %1678 = vrcp.f32 %v933_v38 }
 0x31b   : > { %v1669_v37 = vpop.eup %1668  ;;  %993 = vst.msk [vmem:[%s2167_s16 + $0x50] sm:$0xff] %vm762_vm2, %v964_v54 }
 0x31c   : > { %v1671_v19 = vpop.eup %1670  ;;  %v970_v55 = vmul.f32 %v1669_v37, %v2135_v24  ;;  %v942_v41 = vpop.xlane.xlu1 %941 }
 0x31d   : > { %v968_v49 = vmul.f32 %v1671_v19, %v2133_v56  ;;  %1680 = vrcp.f32 %v942_v41  ;;  %v939_v34 = vpop.xlane.xlu0 %938 }
 0x31e   : > { %996 = vst.msk [vmem:[%s2167_s16 + $0x68] sm:$0xff] %vm762_vm2, %v970_v55  ;;  %1682 = vrcp.f32 %v939_v34 }
 0x31f   : > { %v1673_v46 = vpop.eup %1672  ;;  %995 = vst.msk [vmem:[%s2167_s16 + $0x60] sm:$0xff] %vm762_vm2, %v968_v49 }
 0x320   : > { %v1675_v57 = vpop.eup %1674  ;;  %v974_v61 = vmul.f32 %v1673_v46, %v2143_v60 }
 0x321   : > { %v972_v24 = vmul.f32 %v1675_v57, %v2141_v25 }
 0x322   : > { %998 = vst.msk [vmem:[%s2167_s16 + $0x78] sm:$0xff] %vm762_vm2, %v974_v61 }
 0x323   : > { %v1677_v56 = vpop.eup %1676  ;;  %997 = vst.msk [vmem:[%s2167_s16 + $0x70] sm:$0xff] %vm762_vm2, %v972_v24 }
 0x324   : > { %v1679_v62 = vpop.eup %1678  ;;  %v978_v3 = vmul.f32 %v1677_v56, %v2151_v2 }
 0x325   : > { %v976_v53 = vmul.f32 %v1679_v62, %v2149_v63  ;;  %1009 = sbr.rel (!%p1831_p4) target bundleno = 875 (0x36b), region = 44 }
 0x326   : > { %1000 = vst.msk [vmem:[%s2167_s16 + $0x88] sm:$0xff] %vm762_vm2, %v978_v3 }
 0x327   : > { %v1681_v8 = vpop.eup %1680  ;;  %999 = vst.msk [vmem:[%s2167_s16 + $0x80] sm:$0xff] %vm762_vm2, %v976_v53 }
 0x328   : > { %v1683_v9 = vpop.eup %1682  ;;  %v982_v60 = vmul.f32 %v1681_v8, %v2159_v58 }
 0x329   : > { %v980_v25 = vmul.f32 %v1683_v9, %v2157_v4 }
 0x32a   : > { %1002 = vst.msk [vmem:[%s2167_s16 + $0x98] sm:$0xff] %vm762_vm2, %v982_v60 }
 0x32b   : > { %1001 = vst.msk [vmem:[%s2167_s16 + $0x90] sm:$0xff] %vm762_vm2, %v980_v25 }
 0x32c   : > { %s2345_s18 = smov (!%p1012_p8, %s1011_s18), 20 }
 0x32d   : > { %s1343_s27 = sshll.u32 %s2345_s18, 7 }
 0x32e   : > { %p1346_p9 = scmp.eq.s32.totalorder %s1343_s27, 0 }
 0x32f   : > { %1684 = sdivrem.u32 (!%p1346_p9), %s2345_s18, 20 }
 0x330   : > { %1020 = sbr.rel (%p1346_p9) target bundleno = 875 (0x36b), region = 48 }
 0x338   : > { %s2241_s26 = spop.drf %1684 }
 0x339   : > { %p1347_p10 = scmp.le.s32.totalorder %s2241_s26, 0 }
 0x33a   : > { %s2338_s21 = smov (!%p1347_p10), %s2235_s24  ;;  %s2339_s6 = smov (!%p1347_p10), %s2167_s16 }
 0x33b   : > { %1252 = sbr.rel (%p1347_p10) target bundleno = 846 (0x34e), region = 124  ;;  %s2250_s28 = smov (!%p1347_p10), 0  }
 0x33c   : > { %s2252_s29 = smov (!%p1347_p10), 0  }
 0x342 LB: >> { %v1122_v63 = vld [vmem:[%s1750_s6] sm:$0xff]  ;;  %v1124_v2 = vld [vmem:[%s1750_s6 + $0x8] sm:$0xff]  ;;  %v1126_v4 = vld [vmem:[%s1750_s6 + $0x10] sm:$0xff]  ;;  %s1162_s30 = sadd.s32 1, %s1754_s28  ;;  %s1116_s29 = sadd.s32 1, %s1758_s29   ;;  %s1758_s29 = sphi %s2252_s29, %s1116_s29   ;;  %s1754_s28 = sphi %s2250_s28, %s2340_s28   ;;  %s1750_s6 = sphi %s2339_s6, %s1167_s6   ;;  %s1746_s21 = sphi %s2338_s21, %s1168_s21  }
 0x343   : >> { %1123 = vst [vmem:[%s1746_s21] sm:$0xff] %v1122_v63  ;;  %1125 = vst [vmem:[%s1746_s21 + $0x8] sm:$0xff] %v1124_v2  ;;  %v1128_v58 = vld [vmem:[%s1750_s6 + $0x18] sm:$0xff]  ;;  %v1130_v10 = vld [vmem:[%s1750_s6 + $0x20] sm:$0xff]  ;;  %p1163_p11 = scmp.ge.s32.totalorder %s1162_s30, %s2241_s26  ;;  %p1115_p12 = scmp.ge.s32.totalorder %s1116_s29, %s2241_s26 }
 0x344   : >> { %1127 = vst [vmem:[%s1746_s21 + $0x10] sm:$0xff] %v1126_v4  ;;  %v1132_v11 = vld [vmem:[%s1750_s6 + $0x28] sm:$0xff]  ;;  %1129 = vst [vmem:[%s1746_s21 + $0x18] sm:$0xff] %v1128_v58  ;;  %v1134_v59 = vld [vmem:[%s1750_s6 + $0x30] sm:$0xff] }
 0x345   : >> { %1131 = vst [vmem:[%s1746_s21 + $0x20] sm:$0xff] %v1130_v10  ;;  %1133 = vst [vmem:[%s1746_s21 + $0x28] sm:$0xff] %v1132_v11  ;;  %v1136_v14 = vld [vmem:[%s1750_s6 + $0x38] sm:$0xff]  ;;  %v1138_v16 = vld [vmem:[%s1750_s6 + $0x40] sm:$0xff]  ;;  %s2347_s30 = smov (%p1163_p11, %s1162_s30), 0 }
 0x346   : >> { %1135 = vst [vmem:[%s1746_s21 + $0x30] sm:$0xff] %v1134_v59  ;;  %1137 = vst [vmem:[%s1746_s21 + $0x38] sm:$0xff] %v1136_v14  ;;  %v1140_v0 = vld [vmem:[%s1750_s6 + $0x48] sm:$0xff]  ;;  %v1142_v20 = vld [vmem:[%s1750_s6 + $0x50] sm:$0xff]  ;;  %s1165_s7 = smul.u32 160, %s2347_s30  ;;  %s2340_s28 = smov %s2347_s30 }
 0x347   : >> { %1139 = vst [vmem:[%s1746_s21 + $0x40] sm:$0xff] %v1138_v16  ;;  %v1144_v21 = vld [vmem:[%s1750_s6 + $0x58] sm:$0xff]  ;;  %1141 = vst [vmem:[%s1746_s21 + $0x48] sm:$0xff] %v1140_v0  ;;  %v1146_v22 = vld [vmem:[%s1750_s6 + $0x60] sm:$0xff]  ;;  %1118 = sbr.rel (!%p1115_p12) target bundleno = 834 (0x342), region = 130 }
 0x348   : >> { %1143 = vst [vmem:[%s1746_s21 + $0x50] sm:$0xff] %v1142_v20  ;;  %1145 = vst [vmem:[%s1746_s21 + $0x58] sm:$0xff] %v1144_v21  ;;  %v1148_v23 = vld [vmem:[%s1750_s6 + $0x68] sm:$0xff]  ;;  %v1150_v1 = vld [vmem:[%s1750_s6 + $0x70] sm:$0xff] }
 0x349   : >> { %1147 = vst [vmem:[%s1746_s21 + $0x60] sm:$0xff] %v1146_v22  ;;  %1149 = vst [vmem:[%s1746_s21 + $0x68] sm:$0xff] %v1148_v23  ;;  %v1152_v26 = vld [vmem:[%s1750_s6 + $0x78] sm:$0xff]  ;;  %v1154_v6 = vld [vmem:[%s1750_s6 + $0x80] sm:$0xff] }
 0x34a   : >> { %1151 = vst [vmem:[%s1746_s21 + $0x70] sm:$0xff] %v1150_v1  ;;  %v1156_v36 = vld [vmem:[%s1750_s6 + $0x88] sm:$0xff]  ;;  %1153 = vst [vmem:[%s1746_s21 + $0x78] sm:$0xff] %v1152_v26  ;;  %v1158_v29 = vld [vmem:[%s1750_s6 + $0x90] sm:$0xff] }
 0x34b   : >> { %1155 = vst [vmem:[%s1746_s21 + $0x80] sm:$0xff] %v1154_v6  ;;  %1157 = vst [vmem:[%s1746_s21 + $0x88] sm:$0xff] %v1156_v36  ;;  %v1160_v30 = vld [vmem:[%s1750_s6 + $0x98] sm:$0xff]  ;;  %s1167_s6 = scalar_lea.vmem %s2167_s16, %s1165_s7 [#allocation2]  }
 0x34c   : >> { %1159 = vst [vmem:[%s1746_s21 + $0x90] sm:$0xff] %v1158_v29  ;;  %1161 = vst [vmem:[%s1746_s21 + $0x98] sm:$0xff] %v1160_v30  ;;  %s1168_s21 = scalar_lea.vmem %s2235_s24, %s1165_s7  }
 0x34e PF: > { %1686 = sdivrem.u32 %s2345_s18, 20 }
 0x34f   : > { %s1348_s8 = smul.u32 160, %s2241_s26 }
 0x351   : > { %s1173_s9 = scalar_lea.vmem %s2167_s16, %s1348_s8 [#allocation2]   ;;  %s1175_s10 = scalar_lea.vmem %s2235_s24, %s1348_s8  }
 0x357   : > { %s1687_s11 = spop.drf %1686 }
 0x358   : > { %p1350_p13 = scmp.le.s32.totalorder %s1687_s11, 0 }
 0x359   : > { %s1760_s12 = smov (!%p1350_p13), %s1175_s10   ;;  %s1764_s13 = smov (!%p1350_p13), %s1173_s9  }
 0x35a   : > { %1266 = sbr.rel (%p1350_p13) target bundleno = 875 (0x36b), region = 135  ;;  %s1768_s14 = smov (!%p1350_p13), 0  }
 0x35b   : > { %s1772_s15 = smov (!%p1350_p13), 0  }
 0x361 LB: >> { %v1185_v31 = vld [vmem:[%s1766_s13] sm:$0xff]  ;;  %s1187_s17 = sadd.s32 1, %s1770_s14  ;;  %s1179_s15 = sadd.s32 1, %s1774_s15   ;;  %s1774_s15 = sphi %s1772_s15, %s1179_s15   ;;  %s1770_s14 = sphi %s1768_s14, %s1769_s14   ;;  %s1766_s13 = sphi %s1764_s13, %s1192_s13   ;;  %s1762_s12 = sphi %s1760_s12, %s1193_s12  }
 0x362   : >> { %1186 = vst [vmem:[%s1762_s12] sm:$0xff] %v1185_v31  ;;  %p1188_p0 = scmp.ge.s32.totalorder %s1187_s17, %s1687_s11  ;;  %p1178_p1 = scmp.ge.s32.totalorder %s1179_s15, %s1687_s11 }
 0x364   : >> { %s2349_s17 = smov (%p1188_p0, %s1187_s17), 0  ;;  %1181 = sbr.rel (!%p1178_p1) target bundleno = 865 (0x361), region = 141 }
 0x365   : >> { %s1351_s16 = sshll.u32 %s2349_s17, 3  ;;  %s1769_s14 = smov %s2349_s17  }
 0x366   : >> { %s1192_s13 = scalar_lea.vmem %s1173_s9, %s1351_s16 [#allocation2]   ;;  %s1193_s12 = scalar_lea.vmem %s1175_s10, %s1351_s16  }
 0x36b PF: > { %p12_p2 = scmp.ge.s32.totalorder %s1821_s22, 4   ;;  %s2341_s18 = smov %s1738_s19 }
 0x36c   : > { %s2342_s19 = smov %s1829_s25  ;;  %s2343_s20 = smov %s1821_s22 }
 0x36d   :  { %14 = sbr.rel (!%p12_p2) target bundleno = 2 (0x2), region = 152 }

</bundles_post_ra>
